<compile_context>
chip_gen: v5e
topology: v5e:2x2
jax: 0.10.0
libtpu: 0.0.40
codegen_flags: <defaults>
</compile_context>

<pallas_src>
import functools

import jax
import jax.numpy as jnp
from jax.experimental import pallas as pl
from jax.experimental.pallas import tpu as pltpu


# Tile caps: 256/256 multiples feed the 2x256x256 MXUs on v6e/v7x; with bf16
# inputs + f32 acc the double-buffered working set is ~1.5 MiB, far below the
# 32 MiB scoped-VMEM limit we request (safe even for v7x's 64 MiB VMEM).
_TM_CAP = 256
_TN_CAP = 256
_TK_CAP = 512
_VMEM_LIMIT_BYTES = 32 * 1024 * 1024


def _round_up(x, m):
    return (x + m - 1) // m * m


def _pick(dim, unit, cap):
    """Return (padded_dim, tile): padded_dim % tile == 0, tile % unit == 0."""
    if dim <= cap:
        t = _round_up(dim, unit)
        return t, t
    padded = _round_up(dim, unit)
    tile = unit
    for cand in range(cap, unit - 1, -unit):
        if padded % cand == 0:
            tile = cand
            break
    return padded, tile


def _pad2(a, rows, cols):
    pr, pc = rows - a.shape[0], cols - a.shape[1]
    if pr == 0 and pc == 0:
        return a
    return jnp.pad(a, ((0, pr), (0, pc)))


def _pad_last(a, cols):
    pc = cols - a.shape[-1]
    if pc == 0:
        return a
    widths = [(0, 0)] * (a.ndim - 1) + [(0, pc)]
    return jnp.pad(a, widths)


def _silu(y):
    # SiLU = y * sigmoid(y); 1/(1+exp(-y)) via EUP exp + EUP approx reciprocal.
    return y * pl.reciprocal(1.0 + jnp.exp(-y), approx=True)


# --------------------------------------------------------------------------
# Kernel 1: tiled (M, N, K) matmul + folded BN + SiLU   (used for 1x1 convs
# and as the fallback for strided kxk convs via im2col)
# --------------------------------------------------------------------------
def _matmul_bn_act_kernel(x_ref, w_ref, scale_ref, bias_ref, o_ref, acc_ref,
                          *, apply_act):
    @pl.when(pl.program_id(2) == 0)
    def _init():
        acc_ref[...] = jnp.zeros_like(acc_ref)

    acc_ref[...] += jnp.dot(x_ref[...], w_ref[...],
                            preferred_element_type=jnp.float32)

    @pl.when(pl.program_id(2) == pl.num_programs(2) - 1)
    def _epilogue():
        y = acc_ref[...] * scale_ref[...] + bias_ref[...]
        if apply_act:
            y = _silu(y)
        o_ref[...] = y.astype(o_ref.dtype)


def fused_matmul_bn_act(xm, w, scale, bias, apply_act=True):
    """xm: (M, K) f32, w: (K, N) f32, scale/bias: (N,). Returns (M, N) f32."""
    M, K = xm.shape
    K2, N = w.shape
    assert K2 == K
    Mp, tm = _pick(M, 8, _TM_CAP)
    Kp, tk = _pick(K, 128, _TK_CAP)
    Np, tn = _pick(N, 128, _TN_CAP)

    xp = _pad2(xm.astype(jnp.bfloat16), Mp, Kp)      # bf16 MXU inputs
    wp = _pad2(w.astype(jnp.bfloat16), Kp, Np)
    sp = _pad2(scale.reshape(1, N).astype(jnp.float32), 1, Np)
    bp = _pad2(bias.reshape(1, N).astype(jnp.float32), 1, Np)

    grid = (Mp // tm, Np // tn, Kp // tk)
    kernel = functools.partial(_matmul_bn_act_kernel, apply_act=apply_act)
    out = pl.pallas_call(
        kernel,
        out_shape=jax.ShapeDtypeStruct((Mp, Np), jnp.float32),
        grid_spec=pltpu.PrefetchScalarGridSpec(
            num_scalar_prefetch=0,
            grid=grid,
            in_specs=[
                pl.BlockSpec((tm, tk), lambda i, j, kk: (i, kk)),
                pl.BlockSpec((tk, tn), lambda i, j, kk: (kk, j)),
                pl.BlockSpec((1, tn), lambda i, j, kk: (0, j)),
                pl.BlockSpec((1, tn), lambda i, j, kk: (0, j)),
            ],
            out_specs=pl.BlockSpec((tm, tn), lambda i, j, kk: (i, j)),
            scratch_shapes=[pltpu.VMEM((tm, tn), jnp.float32)],
        ),
        compiler_params=pltpu.CompilerParams(
            dimension_semantics=("parallel", "parallel", "arbitrary"),
            vmem_limit_bytes=_VMEM_LIMIT_BYTES,
        ),
        cost_estimate=pl.CostEstimate(
            flops=2 * Mp * Np * Kp,
            transcendentals=Mp * Np,
            bytes_accessed=Mp * Kp * 2 + Kp * Np * 2 + Mp * Np * 4,
        ),
    )(xp, wp, sp, bp)
    if Mp != M or Np != N:
        out = out[:M, :N]
    return out


# --------------------------------------------------------------------------
# Kernel 2: kxk stride-1 conv + BN + SiLU with in-kernel tap accumulation
# (no HBM im2col: the padded input is read once, taps are shifted 2-D slices
#  of the flattened image accumulated into a VMEM f32 scratch)
# --------------------------------------------------------------------------
def _conv_kxk_bn_act_kernel(x2_ref, w_ref, scale_ref, bias_ref, o_ref, acc_ref,
                            *, k, wx, m_wide, cin, apply_act):
    # x2_ref: (1, (Hx+1)*Wx, Cin) bf16   flattened zero-padded image (1 batch)
    # w_ref : (k*k*Cin, tn)       bf16   rows ordered (kh, kw, cin)
    # o_ref : (1, m_wide, tn)     f32    "wide" rows = Ho * Wx
    x2 = x2_ref[0]
    w = w_ref[...]
    acc_ref[...] = jnp.zeros_like(acc_ref)
    for dh in range(k):
        for dw in range(k):
            off = dh * wx + dw
            t = dh * k + dw
            xt = x2[off:off + m_wide, :]                 # shifted window
            wt = w[t * cin:(t + 1) * cin, :]
            acc_ref[...] += jnp.dot(xt, wt, preferred_element_type=jnp.float32)
    y = acc_ref[...] * scale_ref[...] + bias_ref[...]
    if apply_act:
        y = _silu(y)
    o_ref[0] = y.astype(o_ref.dtype)


def _conv_kxk_s1_nhwc(x_nhwc, w_oihw, scale, bias, pad, apply_act):
    N, H, W, Cin = x_nhwc.shape
    Cout, _, k, _ = w_oihw.shape
    Hx, Wx = H + 2 * pad, W + 2 * pad
    Ho, Wo = Hx - k + 1, Wx - k + 1
    m_wide = Ho * Wx

    # zero-pad spatially + one extra bottom row so every tap-shifted flattened
    # window stays in bounds; the reshape to 2-D rows is a free metadata op.
    xp = jnp.pad(x_nhwc, ((0, 0), (pad, pad + 1), (pad, pad), (0, 0)))
    x2 = xp.astype(jnp.bfloat16).reshape(N, (Hx + 1) * Wx, Cin)

    wm = jnp.transpose(w_oihw, (2, 3, 1, 0)).reshape(k * k * Cin, Cout)
    Coutp, tn = _pick(Cout, 128, _TN_CAP)                # lane-dense output
    wm = _pad_last(wm.astype(jnp.bfloat16), Coutp)
    sp = _pad_last(scale.reshape(1, Cout).astype(jnp.float32), Coutp)
    bp = _pad_last(bias.reshape(1, Cout).astype(jnp.float32), Coutp)

    kernel = functools.partial(_conv_kxk_bn_act_kernel, k=k, wx=Wx,
                               m_wide=m_wide, cin=Cin, apply_act=apply_act)
    # TODO(synk): for very large feature maps the per-batch whole-image block
    # should be H-tiled with halo rows via manual DMA (pl.ANY + make_async_copy).
    out_wide = pl.pallas_call(
        kernel,
        out_shape=jax.ShapeDtypeStruct((N, m_wide, Coutp), jnp.float32),
        grid_spec=pltpu.PrefetchScalarGridSpec(
            num_scalar_prefetch=0,
            grid=(N, Coutp // tn),
            in_specs=[
                pl.BlockSpec((1, (Hx + 1) * Wx, Cin), lambda b, j: (b, 0, 0)),
                pl.BlockSpec((k * k * Cin, tn), lambda b, j: (0, j)),
                pl.BlockSpec((1, tn), lambda b, j: (0, j)),
                pl.BlockSpec((1, tn), lambda b, j: (0, j)),
            ],
            out_specs=pl.BlockSpec((1, m_wide, tn), lambda b, j: (b, 0, j)),
            scratch_shapes=[pltpu.VMEM((m_wide, tn), jnp.float32)],
        ),
        compiler_params=pltpu.CompilerParams(
            dimension_semantics=("parallel", "parallel"),
            vmem_limit_bytes=_VMEM_LIMIT_BYTES,
        ),
        cost_estimate=pl.CostEstimate(
            flops=2 * N * m_wide * Coutp * k * k * Cin,
            transcendentals=N * m_wide * Coutp,
            bytes_accessed=(x2.size * 2 + wm.size * 2 + N * m_wide * Coutp * 4),
        ),
    )(x2, wm, sp, bp)

    out = out_wide.reshape(N, Ho, Wx, Coutp)[:, :, :Wo, :Cout]
    return out


# --------------------------------------------------------------------------
# Conv + BN + SiLU wrappers
# --------------------------------------------------------------------------
def conv_bn_act_nhwc(x_nhwc, w_oihw, scale, bias, *, stride=1, padding=None,
                     apply_act=True):
    """NHWC-native fused Conv+BN+SiLU (no layout transposes on the hot path)."""
    N, H, W, Cin = x_nhwc.shape
    Cout, Cin_w, k, k2 = w_oihw.shape
    assert k == k2 and Cin_w == Cin
    p = (k // 2) if padding is None else padding          # autopad(k)

    if k == 1:
        x = x_nhwc
        if p > 0:
            x = jnp.pad(x, ((0, 0), (p, p), (p, p), (0, 0)))
        if stride > 1:
            x = x[:, ::stride, ::stride, :]
        Nb, Ho, Wo, _ = x.shape
        xm = x.reshape(Nb * Ho * Wo, Cin)
        wm = w_oihw.reshape(Cout, Cin).T
        y = fused_matmul_bn_act(xm, wm, scale, bias, apply_act)
        return y.reshape(Nb, Ho, Wo, Cout)

    if stride == 1:
        return _conv_kxk_s1_nhwc(x_nhwc, w_oihw, scale, bias, p, apply_act)

    # TODO(synk): strided k>1 conv falls back to a JAX-side im2col (extra HBM
    # traffic); a fused halo-tile manual-DMA kernel is left for production.
    Ho = (H + 2 * p - k) // stride + 1
    Wo = (W + 2 * p - k) // stride + 1
    xp = jnp.pad(x_nhwc, ((0, 0), (p, p), (p, p), (0, 0)))
    cols = [
        xp[:, dh:dh + (Ho - 1) * stride + 1:stride,
              dw:dw + (Wo - 1) * stride + 1:stride, :]
        for dh in range(k) for dw in range(k)
    ]
    patches = jnp.concatenate(cols, axis=-1)               # (N, Ho, Wo, k*k*Cin)
    xm = patches.reshape(N * Ho * Wo, k * k * Cin)
    wm = jnp.transpose(w_oihw, (2, 3, 1, 0)).reshape(k * k * Cin, Cout)
    y = fused_matmul_bn_act(xm, wm, scale, bias, apply_act)
    return y.reshape(N, Ho, Wo, Cout)


def conv_module_forward(x_nchw, w_oihw, scale, bias, *, stride=1, padding=None,
                        groups=1, apply_act=True):
    """PyTorch-parity entry point (NCHW in / NCHW out) for Conv.forward."""
    assert groups == 1  # TODO(synk): grouped conv (g>1) not implemented.
    x = jnp.transpose(x_nchw, (0, 2, 3, 1))                # NCHW -> NHWC
    y = conv_bn_act_nhwc(x, w_oihw, scale, bias, stride=stride,
                         padding=padding, apply_act=apply_act)
    return jnp.transpose(y, (0, 3, 1, 2))                  # NHWC -> NCHW


# --------------------------------------------------------------------------
# Deterministic parameter init (Conv weight + folded BatchNorm affine)
# --------------------------------------------------------------------------
def init_conv_params(key, c_in, c_out, k):
    kw, kg, kb, km, kv = jax.random.split(key, 5)
    w = 0.1 * jax.random.normal(kw, (c_out, c_in, k, k), jnp.float32)
    gamma = 1.0 + 0.1 * jax.random.normal(kg, (c_out,), jnp.float32)
    beta = 0.05 * jax.random.normal(kb, (c_out,), jnp.float32)
    mean = 0.02 * jax.random.normal(km, (c_out,), jnp.float32)
    var = 1.0 + 0.1 * jnp.abs(jax.random.normal(kv, (c_out,), jnp.float32))
    eps = 1e-3  # BatchNorm2d(eps=0.001)
    scale = gamma / jnp.sqrt(var + eps)
    bias = beta - mean * scale
    return w, scale, bias


def conv_bn_silu_reference(x_nchw, w, scale, bias, stride, padding,
                           apply_act=True):
    k = w.shape[2]
    p = (k // 2) if padding is None else padding
    y = jax.lax.conv_general_dilated(
        x_nchw, w, window_strides=(stride, stride),
        padding=[(p, p), (p, p)],
        dimension_numbers=("NCHW", "OIHW", "NCHW"))
    y = y * scale[None, :, None, None] + bias[None, :, None, None]
    if apply_act:
        y = y * jax.nn.sigmoid(y)
    return y


if __name__ == "__main__":
    key = jax.random.PRNGKey(0)
    kx, kp1, kp3, kps = jax.random.split(key, 4)
    x = jax.random.normal(kx, (2, 4, 16, 16), jnp.float32)   # NCHW

    cases = [
        (init_conv_params(kp1, 4, 8, 1), 1),  # Conv(4, 8) defaults: 1x1, s=1
        (init_conv_params(kp3, 4, 8, 3), 1),  # Conv(4, 8, 3, 1): 3x3, s=1
        (init_conv_params(kps, 4, 8, 3), 2),  # Conv(4, 8, 3, 2): 3x3, s=2
    ]
    for (w, scale, bias), s in cases:
        out = conv_module_forward(x, w, scale, bias, stride=s)
        ref = conv_bn_silu_reference(x, w, scale, bias, s, None)
        out, ref = jax.block_until_ready((out, ref))
        assert out.shape == ref.shape, (out.shape, ref.shape)
        assert bool(jnp.all(jnp.isfinite(out)))
        err = float(jnp.max(jnp.abs(out - ref)))
        assert err < 0.1, f"max abs err {err}"
    print("KERNEL_OK")
</pallas_src>

<mosaic_0001>
module attributes {stable_mosaic.version = 11 : i64} {
  func.func @_matmul_bn_act_kernel(%arg0: i32, %arg1: i32, %arg2: i32, %arg3: memref<256x128xbf16, #tpu.memory_space<vmem>>, %arg4: memref<128x128xbf16, #tpu.memory_space<vmem>>, %arg5: memref<1x128xf32, #tpu.memory_space<vmem>>, %arg6: memref<1x128xf32, #tpu.memory_space<vmem>>, %arg7: memref<256x128xf32, #tpu.memory_space<vmem>>, %arg8: memref<256x128xf32, #tpu.memory_space<vmem>>) attributes {dimension_semantics = [#tpu.dimension_semantics<parallel>, #tpu.dimension_semantics<parallel>, #tpu.dimension_semantics<arbitrary>], iteration_bounds = array<i64: 2, 1, 1>, scalar_prefetch = 0 : i64, scratch_operands = 1 : i64, tpu.core_type = #tpu.core_type<tc>, window_params = [{transform_indices = @transform_0, window_bounds = array<i64: 256, 128>}, {transform_indices = @transform_1, window_bounds = array<i64: 128, 128>}, {transform_indices = @transform_2, window_bounds = array<i64: 1, 128>}, {transform_indices = @transform_3, window_bounds = array<i64: 1, 128>}, {transform_indices = @transform_4, window_bounds = array<i64: 256, 128>}]} {
    %c0_i32 = arith.constant 0 : i32
    %0 = arith.cmpi eq, %arg2, %c0_i32 : i32
    %1 = arith.extui %0 : i1 to i32
    %c0_i32_0 = arith.constant 0 : i32
    %2 = arith.cmpi ne, %1, %c0_i32_0 : i32
    scf.if %2 {
      %cst_10 = arith.constant 0.000000e+00 : f32
      %12 = vector.broadcast %cst_10 : f32 to vector<256x128xf32>
      %c0_11 = arith.constant 0 : index
      %c0_12 = arith.constant 0 : index
      %13 = vector.load %arg8[%c0_11, %c0_12] : memref<256x128xf32, #tpu.memory_space<vmem>>, vector<256x128xf32>
      tpu.vector_store %arg8[%c0_11, %c0_12], %12 {strides = array<i32>} : memref<256x128xf32, #tpu.memory_space<vmem>>, vector<256x128xf32>,
    } else {
    }
    %c0 = arith.constant 0 : index
    %c0_1 = arith.constant 0 : index
    %3 = vector.load %arg8[%c0, %c0_1] : memref<256x128xf32, #tpu.memory_space<vmem>>, vector<256x128xf32>
    %c0_2 = arith.constant 0 : index
    %c0_3 = arith.constant 0 : index
    %4 = vector.load %arg3[%c0_2, %c0_3] : memref<256x128xbf16, #tpu.memory_space<vmem>>, vector<256x128xbf16>
    %c0_4 = arith.constant 0 : index
    %c0_5 = arith.constant 0 : index
    %5 = vector.load %arg4[%c0_4, %c0_5] : memref<128x128xbf16, #tpu.memory_space<vmem>>, vector<128x128xbf16>
    %cst = arith.constant dense<0.000000e+00> : vector<256x128xf32>
    %6 = tpu.matmul %4, %5, %cst {dimension_numbers = #tpu.dot_dimension_numbers<[1], [0], [0], [1], [0, 0, 1, 1], [], []>} : vector<256x128xbf16>, vector<128x128xbf16>, vector<256x128xf32> -> vector<256x128xf32>
    %7 = arith.addf %3, %6 : vector<256x128xf32>
    %c0_6 = arith.constant 0 : index
    %c0_7 = arith.constant 0 : index
    %8 = vector.load %arg8[%c0_6, %c0_7] : memref<256x128xf32, #tpu.memory_space<vmem>>, vector<256x128xf32>
    tpu.vector_store %arg8[%c0_6, %c0_7], %7 {strides = array<i32>} : memref<256x128xf32, #tpu.memory_space<vmem>>, vector<256x128xf32>,
    %c0_i32_8 = arith.constant 0 : i32
    %9 = arith.cmpi eq, %arg2, %c0_i32_8 : i32
    %10 = arith.extui %9 : i1 to i32
    %c0_i32_9 = arith.constant 0 : i32
    %11 = arith.cmpi ne, %10, %c0_i32_9 : i32
    scf.if %11 {
      %c0_10 = arith.constant 0 : index
      %c0_11 = arith.constant 0 : index
      %12 = vector.load %arg8[%c0_10, %c0_11] : memref<256x128xf32, #tpu.memory_space<vmem>>, vector<256x128xf32>
      %c0_12 = arith.constant 0 : index
      %c0_13 = arith.constant 0 : index
      %13 = vector.load %arg5[%c0_12, %c0_13] : memref<1x128xf32, #tpu.memory_space<vmem>>, vector<1x128xf32>
      %14 = vector.broadcast %13 : vector<1x128xf32> to vector<256x128xf32>
      %15 = arith.mulf %12, %14 : vector<256x128xf32>
      %c0_14 = arith.constant 0 : index
      %c0_15 = arith.constant 0 : index
      %16 = vector.load %arg6[%c0_14, %c0_15] : memref<1x128xf32, #tpu.memory_space<vmem>>, vector<1x128xf32>
      %17 = vector.broadcast %16 : vector<1x128xf32> to vector<256x128xf32>
      %18 = arith.addf %15, %17 : vector<256x128xf32>
      %cst_16 = arith.constant 0.000000e+00 : f32
      %19 = vector.broadcast %cst_16 : f32 to vector<256x128xf32>
      %20 = arith.subf %19, %18 : vector<256x128xf32>
      %21 = math.exp %20 : vector<256x128xf32>
      %cst_17 = arith.constant 1.000000e+00 : f32
      %22 = vector.broadcast %cst_17 : f32 to vector<256x128xf32>
      %23 = arith.addf %22, %21 : vector<256x128xf32>
      %24 = tpu.reciprocal %23 {approx = true} : vector<256x128xf32> -> vector<256x128xf32>
      %25 = arith.mulf %18, %24 : vector<256x128xf32>
      %c0_18 = arith.constant 0 : index
      %c0_19 = arith.constant 0 : index
      %26 = vector.load %arg7[%c0_18, %c0_19] : memref<256x128xf32, #tpu.memory_space<vmem>>, vector<256x128xf32>
      tpu.vector_store %arg7[%c0_18, %c0_19], %25 {strides = array<i32>} : memref<256x128xf32, #tpu.memory_space<vmem>>, vector<256x128xf32>,
    } else {
    }
    return
  }
  func.func @transform_0(%arg0: i32, %arg1: i32, %arg2: i32) -> (i32, i32) {
    %c0_i32 = arith.constant 0 : i32
    return %arg0, %arg2 : i32, i32
  }
  func.func @transform_1(%arg0: i32, %arg1: i32, %arg2: i32) -> (i32, i32) {
    %c0_i32 = arith.constant 0 : i32
    return %arg2, %arg1 : i32, i32
  }
  func.func @transform_2(%arg0: i32, %arg1: i32, %arg2: i32) -> (i32, i32) {
    %c0_i32 = arith.constant 0 : i32
    %c0_i32_0 = arith.constant 0 : i32
    return %c0_i32, %arg1 : i32, i32
  }
  func.func @transform_3(%arg0: i32, %arg1: i32, %arg2: i32) -> (i32, i32) {
    %c0_i32 = arith.constant 0 : i32
    %c0_i32_0 = arith.constant 0 : i32
    return %c0_i32, %arg1 : i32, i32
  }
  func.func @transform_4(%arg0: i32, %arg1: i32, %arg2: i32) -> (i32, i32) {
    %c0_i32 = arith.constant 0 : i32
    return %arg0, %arg1 : i32, i32
  }
}

</mosaic_0001>

<bundles_post_ra>
// kernel: tpu_custom_call.1
= control target key start
LH: loop header
LB: loop body
LE: loop exit
PB: predicated region body
PF: predicated region fallthrough
CT: control target
= control target key end

     0   :  { %s2151_s0 = inlined_call_operand.hbm [shape: bf16[512,128], index: 0, kind: input, shape index: {}]   ;;  %s2152_s1 = inlined_call_operand.hbm [shape: bf16[128,128], index: 1, kind: input, shape index: {}]   ;;  %s2153_s2 = inlined_call_operand.vmem [shape: f32[1,128], index: 2, kind: input, shape index: {}]   ;;  %s2154_s3 = inlined_call_operand.vmem [shape: f32[1,128], index: 3, kind: input, shape index: {}]   ;;  %s2155_s4 = inlined_call_operand.hbm [shape: f32[512,128], index: 4, kind: output, shape index: {}]  }
   0x1   :  { %2159 = sst [smem:[#allocation13_spill]] %s2152_s1 }
   0x2   :  { %9 = vsyncpa [#allocation4], 0 }
   0x3   :  { %11 = vsyncpa [#allocation4 + $0x1], 0 }
   0x4   :  { %12 = vsyncpa [#allocation7], 0 }
   0x5   :  { %13 = vsyncpa [#allocation5], 0 }
   0x6   :  { %15 = vsyncpa [#allocation5 + $0x1], 0  ;;  %s1738_s15 = smov 0   ;;  %s1740_s16 = smov 0  }
   0x7   :  { %s1742_s17 = smov 0   ;;  %s1744_s18 = smov 0  }
   0x8   :  { %s1746_s19 = smov 0   ;;  %s1748_s20 = smov 0  }
   0x9 LB: > { %s1188_s21 = sadd.s32 4294967295, %s1706_s20   ;;  %s1189_s22 = sadd.s32 4294967294, %s1706_s20   ;;  %s1706_s20 = sphi %s1748_s20, %s21_s20   ;;  %s1702_s19 = sphi %s1746_s19, %s2176_s19   ;;  %s1698_s18 = sphi %s1744_s18, %s2175_s18   ;;  %s1694_s17 = sphi %s1742_s17, %s2174_s17   ;;  %s1690_s16 = sphi %s1740_s16, %s2173_s16   ;;  %s1686_s15 = sphi %s1738_s15, %s2172_s15  }
   0xa   : > { %p62_p0 = scmp.ne.s32.totalorder %s1690_s16, %s1686_s15  ;;  %p1772_p1 = scmp.eq.s32.totalorder %s1188_s21, 0 }
   0xb   : > { %p1776_p2 = scmp.eq.s32.totalorder %s1188_s21, 1  ;;  %p174_p3 = scmp.eq.s32.totalorder %s1189_s22, 1 }
   0xc   : > { %p1782_p4 = por %p1772_p1, %p62_p0  ;;  %p1190_p5 = scmp.ge.s32.totalorder %s1706_s20, 1 }
   0xd   : > { %p1787_p6 = por %p174_p3, %p62_p0  ;;  %p181_p7 = scmp.lt.s32.totalorder %s1706_s20, 3 }
   0xe   : > { %s2164_s1 = sld [smem:[#allocation13_spill]]  ;;  %s1708_s5 = smov [#allocation6]  }
   0xf   : > { %p1795_p8 = pnand %p1190_p5, %p181_p7  ;;  %s198_s6 = sshll.u32 %s1708_s5, 4  ;;  %s199_s6 = int_to_ptr.vmem [resolvable:$true] %s198_s6 }
  0x10   : > { %p1194_p11 = scmp.ge.s32.totalorder %s1706_s20, 2  ;;  %s2156_s7 = smov 64  }
  0x11   : > { %p1361_p9 = pneg %p1795_p8  ;;  %s2157_s8 = smov 4  }
  0x12   : > { %s40_s9 = sadd.s32 1, %s1702_s19  ;;  %s49_s10 = sadd.s32 1, %s1694_s17 }
  0x13   : > { %p1362_p10 = pnand %p1361_p9, %p1772_p1  ;;  %p42_p12 = scmp.ge.s32.totalorder %s40_s9, 2 }
  0x14   : > { %s196_s29 = sshll.u32 %s2164_s1, 4  ;;  %p56_p13 = scmp.ne.s32.totalorder %s1694_s17, %s1690_s16  ;;  %s197_s29 = int_to_ptr.hbm [resolvable:$true] %s196_s29 }
  0x15   : > { %1364 = dma.hbm_to_vmem [thread:$0]  (!%p1362_p10), %s197_s29, 1024, %s199_s6, [#allocation7], %s2156_s7, %s2156_s7, %s2157_s8  }
  0x16   : > { %p57_p0 = scmp.eq.s32.totalorder %s1706_s20, 0  ;;  %s2178_s9 = smov (%p42_p12, %s40_s9), 0 }
  0x17   : > { %2166 = sst [smem:[#allocation12_spill]] %s2178_s9  ;;  %p1820_p5 = por %p1776_p2, %p56_p13 }
  0x18   : > { %p1814_p3 = por %p57_p0, %p56_p13  ;;  %s44_s13 = ssub.s32 %s1702_s19, %s2178_s9 }
  0x19   : > { %p1374_p7 = scmp.lt.s32.totalorder %s1706_s20, 2  ;;  %p47_p9 = scmp.eq.s32.totalorder %s44_s13, 0 }
  0x1a   : > { %s224_s14 = sand.u32 1, %s1694_s17   ;;  %s1303_s27 = sshll.u32 %s1702_s19, 7 }
  0x1b   : > { %s1195_s21 = sshll.u32 %s224_s14, 7  ;;  %s234_s5 = scalar_lea.hbm %s2151_s0, %s1303_s27 }
  0x1c   : > { %s1829_s22 = scalar_select %p47_p9, %s1694_s17, %s49_s10  }
  0x1d   : > { %s228_s6 = scalar_lea.vmem [#allocation3], %s1195_s21  ;;  %s235_s24 = sshll.u32 %s234_s5, 4  ;;  %s236_s24 = int_to_ptr.hbm [resolvable:$true] %s235_s24 }
  0x1e   : > { %s237_s7 = sshll.u32 %s228_s6, 4  ;;  %p1366_p2 = pnand %p1374_p7, %p1814_p3  ;;  %s238_s7 = int_to_ptr.vmem [resolvable:$true] %s237_s7 }
  0x1f   : > { %s225_s8 = scalar_lea.sflag [#allocation4], %s224_s14  ;;  %s2169_s1 = smov 4  }
  0x20   : > { %s2170_s9 = smov 64   ;;  %249 = sbr.rel (%p1795_p8) target bundleno = 298 (0x12a), region = 36 }
  0x21   : > { %1368 = dma.hbm_to_vmem [thread:$0]  (!%p1366_p2), %s236_s24, 2048, %s238_s7, %s225_s8, %s2170_s9, %s2170_s9, %s2169_s1  }
  0x22   : > { %s1843_s10 = sand.u32 (!%p1795_p8), 1, %s1690_s16  }
  0x23   : > { %s1199_s13 = sshll.u32 (!%p1795_p8), %s1843_s10, 7  ;;  %s252_s21 = scalar_lea.sflag (!%p1795_p8), [#allocation4], %s1843_s10 }
  0x24   : > { %s1847_s27 = scalar_lea.vmem (!%p1795_p8), [#allocation3], %s1199_s13 }
  0x25   : > { %1673 = dma.done.wait (%p1782_p4), %s252_s21, 2048  }
  0x26   : > { %1675 = vsyncadd (%p1782_p4), %s252_s21, 4294965248 }
  0x27   : > { %1677 = dma.done.wait (%p1772_p1), [#allocation7], 1024  }
  0x28   : > { %1679 = vsyncadd (%p1772_p1), [#allocation7], 4294966272  ;;  %v1327_v0 = vld [vmem:[#allocation6 + $0x38] sm:$0xff]  ;;  %v1326_v1 = vld [vmem:[#allocation6 + $0x30] sm:$0xff]  ;;  %s1201_s7 = sshll.u32 %s1843_s10, 8  ;;  %s1328_s9 = sshll.u32 %s1698_s18, 8 }
  0x29   : > { %561 = vmatpush.bf16.msra.mxu0 %v1327_v0  ;;  %1329 = vmatpush.bf16.msra.mxu1 %v1327_v0  ;;  %v1325_v2 = vld [vmem:[#allocation6 + $0x28] sm:$0xff]  ;;  %v1324_v3 = vld [vmem:[#allocation6 + $0x20] sm:$0xff]  ;;  %v1323_v4 = vld [vmem:[#allocation6 + $0x18] sm:$0xff]  ;;  %s1948_s8 = scalar_lea.vmem [#allocation8], %s1201_s7  ;;  %s1058_s28 = scalar_lea.hbm %s2155_s4, %s1328_s9 }
  0x2a   : > { %1330 = vmatpush.bf16.msra.mxu2 %v1327_v0  ;;  %1331 = vmatpush.bf16.msra.mxu3 %v1327_v0  ;;  %v1322_v5 = vld [vmem:[#allocation6 + $0x10] sm:$0xff]  ;;  %v1321_v6 = vld [vmem:[#allocation6 + $0x8] sm:$0xff]  ;;  %v1320_v7 = vld [vmem:[#allocation6] sm:$0xff]  ;;  %s1059_s29 = sshll.u32 %s1948_s8, 4  ;;  %s1061_s18 = sshll.u32 %s1058_s28, 4  ;;  %s1060_s29 = int_to_ptr.vmem [resolvable:$true] %s1059_s29  ;;  %s1062_s18 = int_to_ptr.hbm [resolvable:$true] %s1061_s18 }
  0x2b   : > { %v1304_v8 = vld [vmem:[%s1847_s27] sm:$0xff]  ;;  %v1305_v12 = vld [vmem:[%s1847_s27 + $0x8] sm:$0xff]  ;;  %v1306_v16 = vld [vmem:[%s1847_s27 + $0x10] sm:$0xff]  ;;  %s1046_s5 = scalar_lea.sflag [#allocation5], %s1843_s10  ;;  %s1634_s6 = sshra.s32 %s1062_s18, 4  ;;  %s1635_s6 = int_to_ptr.hbm [resolvable:$true] %s1634_s6 }
  0x2c   : > { %v1308_v9 = vld [vmem:[%s1847_s27 + $0x20] sm:$0xff]  ;;  %v1309_v13 = vld [vmem:[%s1847_s27 + $0x28] sm:$0xff]  ;;  %v1310_v17 = vld [vmem:[%s1847_s27 + $0x30] sm:$0xff]  ;;  %s1636_s24 = scalar_lea.hbm %s1635_s6, 256  ;;  %p1641_p10 = scmp.lt.s32.totalorder %s1635_s6, %s2155_s4 }
  0x2d   : > { %562 = vmatpush.bf16.msra.mxu0 %v1326_v1  ;;  %1332 = vmatpush.bf16.msra.mxu1 %v1326_v1  ;;  %v1312_v10 = vld [vmem:[%s1847_s27 + $0x40] sm:$0xff]  ;;  %v1313_v14 = vld [vmem:[%s1847_s27 + $0x48] sm:$0xff]  ;;  %v1314_v18 = vld [vmem:[%s1847_s27 + $0x50] sm:$0xff]  ;;  %p1637_p1 = scmp.ne.s32.totalorder %s1635_s6, %s1636_s24 }
  0x2e   : > { %1333 = vmatpush.bf16.msra.mxu2 %v1326_v1  ;;  %1334 = vmatpush.bf16.msra.mxu3 %v1326_v1  ;;  %v1316_v11 = vld [vmem:[%s1847_s27 + $0x60] sm:$0xff]  ;;  %v1317_v15 = vld [vmem:[%s1847_s27 + $0x68] sm:$0xff]  ;;  %v1318_v19 = vld [vmem:[%s1847_s27 + $0x70] sm:$0xff] }
  0x2f   : > { %v1307_v20 = vld [vmem:[%s1847_s27 + $0x18] sm:$0xff]  ;;  %v1876_v24 = vld [vmem:[%s2153_s2] ss:$0 sm:$0xff]  ;;  %p1638_p4 = pnand %p1637_p1, %p1820_p5 }
  0x30   : > { %v1311_v21 = vld [vmem:[%s1847_s27 + $0x38] sm:$0xff]  ;;  %v1881_v25 = vld [vmem:[%s2154_s3] ss:$0 sm:$0xff] }
  0x31   : > { %563 = vmatpush.bf16.msra.mxu0 %v1325_v2  ;;  %1335 = vmatpush.bf16.msra.mxu1 %v1325_v2  ;;  %v1315_v22 = vld [vmem:[%s1847_s27 + $0x58] sm:$0xff]  ;;  %p1639_p8 = pneg %p1638_p4 }
  0x32   : > { %1336 = vmatpush.bf16.msra.mxu2 %v1325_v2  ;;  %1337 = vmatpush.bf16.msra.mxu3 %v1325_v2  ;;  %v1319_v23 = vld [vmem:[%s1847_s27 + $0x78] sm:$0xff]  ;;  %s1640_s27 = scalar_lea.hbm %s2155_s4, 512 }
  0x33   : > { %p1642_p12 = scmp.lt.s32.totalorder %s1640_s27, %s1636_s24 }
  0x35   : > { %564 = vmatpush.bf16.msra.mxu0 %v1324_v3  ;;  %1338 = vmatpush.bf16.msra.mxu1 %v1324_v3  ;;  %p1643_p13 = por %p1642_p12, %p1641_p10 }
  0x36   : > { %1339 = vmatpush.bf16.msra.mxu2 %v1324_v3  ;;  %1340 = vmatpush.bf16.msra.mxu3 %v1324_v3 }
  0x37   : > { %p1644_p0 = pnand %p1643_p13, %p1639_p8 }
  0x39   : > { %565 = vmatpush.bf16.msra.mxu0 %v1323_v4  ;;  %1341 = vmatpush.bf16.msra.mxu1 %v1323_v4 }
  0x3a   : > { %1342 = vmatpush.bf16.msra.mxu2 %v1323_v4  ;;  %1343 = vmatpush.bf16.msra.mxu3 %v1323_v4 }
  0x3d   : > { %566 = vmatpush.bf16.msra.mxu0 %v1322_v5  ;;  %1344 = vmatpush.bf16.msra.mxu1 %v1322_v5 }
  0x3e   : > { %1345 = vmatpush.bf16.msra.mxu2 %v1322_v5  ;;  %1346 = vmatpush.bf16.msra.mxu3 %v1322_v5 }
  0x41   : > { %567 = vmatpush.bf16.msra.mxu0 %v1321_v6  ;;  %1347 = vmatpush.bf16.msra.mxu1 %v1321_v6 }
  0x42   : > { %1348 = vmatpush.bf16.msra.mxu2 %v1321_v6  ;;  %1349 = vmatpush.bf16.msra.mxu3 %v1321_v6 }
  0x45   : > { %568 = vmatpush.bf16.msra.mxu0 %v1320_v7  ;;  %1350 = vmatpush.bf16.msra.mxu1 %v1320_v7 }
  0x46   : > { %1351 = vmatpush.bf16.msra.mxu2 %v1320_v7  ;;  %1352 = vmatpush.bf16.msra.mxu3 %v1320_v7 }
  0x48   : > { %569 = vmatmul.bf16.vlgmr.msra.gmra.mxu0 %v1304_v8  ;;  %589 = vmatmul.bf16.vlgmr.msra.gmra.mxu1 %v1308_v9 }
  0x49   : > { %609 = vmatmul.bf16.vlgmr.msra.gmra.mxu2 %v1312_v10  ;;  %629 = vmatmul.bf16.vlgmr.msra.gmra.mxu3 %v1316_v11 }
  0x58   : > { %574 = vmatmul.bf16.gmra.mxu0 %v1305_v12  ;;  %594 = vmatmul.bf16.gmra.mxu1 %v1309_v13 }
  0x59   : > { %614 = vmatmul.bf16.gmra.mxu2 %v1313_v14  ;;  %634 = vmatmul.bf16.gmra.mxu3 %v1317_v15 }
  0x68   : > { %579 = vmatmul.bf16.gmra.mxu0 %v1306_v16  ;;  %599 = vmatmul.bf16.gmra.mxu1 %v1310_v17 }
  0x69   : > { %619 = vmatmul.bf16.gmra.mxu2 %v1314_v18  ;;  %639 = vmatmul.bf16.gmra.mxu3 %v1318_v19 }
  0x78   : > { %584 = vmatmul.bf16.gmra.mxu0 %v1307_v20  ;;  %604 = vmatmul.bf16.gmra.mxu1 %v1311_v21 }
  0x79   : > { %624 = vmatmul.bf16.gmra.mxu2 %v1315_v22  ;;  %644 = vmatmul.bf16.gmra.mxu3 %v1319_v23 }
  0xc5   : > { %v570_v26 = vpop.f32.mrf.mxu0  ;;  %v590_v27 = vpop.f32.mrf.mxu1 }
  0xc6   : > { %v753_v28 = vmul.f32 %v1876_v24, %v570_v26  ;;  %v761_v29 = vmul.f32 %v1876_v24, %v590_v27 }
  0xc8   : > { %v1886_v30 = vadd.f32 %v1881_v25, %v753_v28  ;;  %v1889_v31 = vadd.f32 %v1881_v25, %v761_v29 }
  0xca   : > { %v821_v32 = vsub.f32 0.0, %v1886_v30  ;;  %v829_v33 = vsub.f32 0.0, %v1889_v31 }
  0xcc   : > { %v853_v34 = vmul.f32 1.442695, %v821_v32  ;;  %v869_v35 = vmul.f32 1.442695, %v829_v33  ;;  %v610_v36 = vpop.f32.mrf.mxu2  ;;  %v630_v37 = vpop.f32.mrf.mxu3 }
  0xcd   : > { %v769_v38 = vmul.f32 %v1876_v24, %v610_v36  ;;  %v777_v39 = vmul.f32 %v1876_v24, %v630_v37  ;;  %v572_v40 = vpop.f32.mrf.mxu0  ;;  %v592_v41 = vpop.f32.mrf.mxu1 }
  0xce   : > { %1432 = vpow2.f32 %v853_v34  ;;  %v754_v42 = vmul.f32 %v1876_v24, %v572_v40  ;;  %v762_v43 = vmul.f32 %v1876_v24, %v592_v41 }
  0xcf   : > { %1434 = vpow2.f32 %v869_v35  ;;  %v1898_v44 = vadd.f32 %v1881_v25, %v769_v38  ;;  %v1901_v45 = vadd.f32 %v1881_v25, %v777_v39 }
  0xd0   : > { %v1904_v46 = vadd.f32 %v1881_v25, %v754_v42  ;;  %v1907_v47 = vadd.f32 %v1881_v25, %v762_v43 }
  0xd1   : > { %v837_v48 = vsub.f32 0.0, %v1898_v44  ;;  %v845_v49 = vsub.f32 0.0, %v1901_v45 }
  0xd2   : > { %v822_v50 = vsub.f32 0.0, %v1904_v46  ;;  %v830_v51 = vsub.f32 0.0, %v1907_v47 }
  0xd3   : > { %v885_v52 = vmul.f32 1.442695, %v837_v48  ;;  %v901_v53 = vmul.f32 1.442695, %v845_v49 }
  0xd4   : > { %v1433_v54 = vpop.eup %1432  ;;  %v855_v55 = vmul.f32 1.442695, %v822_v50  ;;  %v871_v56 = vmul.f32 1.442695, %v830_v51  ;;  %v612_v57 = vpop.f32.mrf.mxu2 }
  0xd5   : > { %v632_v58 = vpop.f32.mrf.mxu3  ;;  %v1435_v59 = vpop.eup %1434  ;;  %v917_v60 = vadd.f32 1.0, %v1433_v54  ;;  %1436 = vpow2.f32 %v885_v52  ;;  %v770_v61 = vmul.f32 %v1876_v24, %v612_v57 }
  0xd6   : > { %v778_v62 = vmul.f32 %v1876_v24, %v632_v58  ;;  %v575_v63 = vpop.f32.mrf.mxu0  ;;  %v595_v0 = vpop.f32.mrf.mxu1  ;;  %v925_v1 = vadd.f32 1.0, %v1435_v59  ;;  %1438 = vpow2.f32 %v901_v53 }
  0xd7   : > { %v755_v2 = vmul.f32 %v1876_v24, %v575_v63  ;;  %v763_v3 = vmul.f32 %v1876_v24, %v595_v0  ;;  %1440 = vrcp.f32 %v917_v60  ;;  %v1918_v4 = vadd.f32 %v1881_v25, %v770_v61 }
  0xd8   : > { %v1921_v5 = vadd.f32 %v1881_v25, %v778_v62  ;;  %1442 = vrcp.f32 %v925_v1 }
  0xd9   : > { %v1924_v6 = vadd.f32 %v1881_v25, %v755_v2  ;;  %v1927_v7 = vadd.f32 %v1881_v25, %v763_v3  ;;  %1444 = vpow2.f32 %v855_v55  ;;  %v838_v8 = vsub.f32 0.0, %v1918_v4 }
  0xda   : > { %v846_v9 = vsub.f32 0.0, %v1921_v5  ;;  %1446 = vpow2.f32 %v871_v56 }
  0xdb   : > { %v823_v10 = vsub.f32 0.0, %v1924_v6  ;;  %v831_v11 = vsub.f32 0.0, %v1927_v7  ;;  %v1437_v12 = vpop.eup %1436  ;;  %v887_v13 = vmul.f32 1.442695, %v838_v8 }
  0xdc   : > { %v903_v14 = vmul.f32 1.442695, %v846_v9  ;;  %v1439_v15 = vpop.eup %1438  ;;  %v933_v16 = vadd.f32 1.0, %v1437_v12  ;;  %v615_v19 = vpop.f32.mrf.mxu2 }
  0xdd   : > { %v857_v17 = vmul.f32 1.442695, %v823_v10  ;;  %v873_v18 = vmul.f32 1.442695, %v831_v11  ;;  %v635_v20 = vpop.f32.mrf.mxu3  ;;  %v1441_v21 = vpop.eup %1440  ;;  %v941_v22 = vadd.f32 1.0, %v1439_v15  ;;  %1448 = vpow2.f32 %v887_v13 }
  0xde   : > { %v771_v23 = vmul.f32 %v1876_v24, %v615_v19  ;;  %v779_v26 = vmul.f32 %v1876_v24, %v635_v20  ;;  %v577_v27 = vpop.f32.mrf.mxu0  ;;  %v597_v28 = vpop.f32.mrf.mxu1  ;;  %v981_v32 = vmul.f32 %v1441_v21, %v1886_v30  ;;  %1450 = vrcp.f32 %v933_v16 }
  0xdf   : > { %v1443_v29 = vpop.eup %1442  ;;  %v756_v33 = vmul.f32 %v1876_v24, %v577_v27  ;;  %v764_v34 = vmul.f32 %v1876_v24, %v597_v28  ;;  %1452 = vrcp.f32 %v941_v22 }
  0xe0   : > { %v1445_v35 = vpop.eup %1444  ;;  %v989_v36 = vmul.f32 %v1443_v29, %v1889_v31  ;;  %v1941_v37 = vadd.f32 %v1881_v25, %v771_v23  ;;  %v1944_v38 = vadd.f32 %v1881_v25, %v779_v26  ;;  %1013 = vst [vmem:[%s1948_s8] sm:$0xff] %v981_v32  ;;  %1454 = vpow2.f32 %v903_v14 }
  0xe1   : > { %v1447_v39 = vpop.eup %1446  ;;  %v918_v30 = vadd.f32 1.0, %v1445_v35  ;;  %v1952_v40 = vadd.f32 %v1881_v25, %v756_v33  ;;  %v1955_v31 = vadd.f32 %v1881_v25, %v764_v34  ;;  %1456 = vpow2.f32 %v857_v17 }
  0xe2   : > { %1021 = vst [vmem:[%s1948_s8 + $0x40] sm:$0xff] %v989_v36  ;;  %v926_v41 = vadd.f32 1.0, %v1447_v39  ;;  %v839_v42 = vsub.f32 0.0, %v1941_v37  ;;  %v847_v43 = vsub.f32 0.0, %v1944_v38 }
  0xe3   : > { %1458 = vrcp.f32 %v918_v30  ;;  %v824_v48 = vsub.f32 0.0, %v1952_v40  ;;  %v832_v49 = vsub.f32 0.0, %v1955_v31  ;;  %v1449_v50 = vpop.eup %1448 }
  0xe4   : > { %1460 = vrcp.f32 %v926_v41  ;;  %v889_v51 = vmul.f32 1.442695, %v839_v42  ;;  %v905_v52 = vmul.f32 1.442695, %v847_v43  ;;  %v1451_v53 = vpop.eup %1450  ;;  %v934_v54 = vadd.f32 1.0, %v1449_v50  ;;  %v617_v57 = vpop.f32.mrf.mxu2 }
  0xe5   : > { %1462 = vpow2.f32 %v873_v18  ;;  %v859_v55 = vmul.f32 1.442695, %v824_v48  ;;  %v875_v56 = vmul.f32 1.442695, %v832_v49  ;;  %v637_v58 = vpop.f32.mrf.mxu3  ;;  %v1453_v59 = vpop.eup %1452  ;;  %v997_v60 = vmul.f32 %v1451_v53, %v1898_v44 }
  0xe6   : > { %1464 = vpow2.f32 %v889_v51  ;;  %v772_v61 = vmul.f32 %v1876_v24, %v617_v57  ;;  %v780_v62 = vmul.f32 %v1876_v24, %v637_v58  ;;  %v580_v63 = vpop.f32.mrf.mxu0  ;;  %v600_v0 = vpop.f32.mrf.mxu1  ;;  %v1005_v2 = vmul.f32 %v1453_v59, %v1901_v45 }
  0xe7   : > { %v1455_v1 = vpop.eup %1454  ;;  %1466 = vrcp.f32 %v934_v54  ;;  %v757_v3 = vmul.f32 %v1876_v24, %v580_v63  ;;  %v765_v8 = vmul.f32 %v1876_v24, %v600_v0  ;;  %1029 = vst [vmem:[%s1948_s8 + $0x80] sm:$0xff] %v997_v60 }
  0xe8   : > { %v1457_v9 = vpop.eup %1456  ;;  %v942_v10 = vadd.f32 1.0, %v1455_v1  ;;  %1468 = vpow2.f32 %v905_v52  ;;  %v1970_v44 = vadd.f32 %v1881_v25, %v772_v61  ;;  %v1973_v11 = vadd.f32 %v1881_v25, %v780_v62  ;;  %1037 = vst [vmem:[%s1948_s8 + $0xc0] sm:$0xff] %v1005_v2 }
  0xe9   : > { %v1459_v12 = vpop.eup %1458  ;;  %v919_v13 = vadd.f32 1.0, %v1457_v9  ;;  %1470 = vpow2.f32 %v859_v55  ;;  %v1977_v45 = vadd.f32 %v1881_v25, %v757_v3  ;;  %v1980_v14 = vadd.f32 %v1881_v25, %v765_v8 }
  0xea   : > { %v1461_v15 = vpop.eup %1460  ;;  %v982_v16 = vmul.f32 %v1459_v12, %v1904_v46  ;;  %1472 = vrcp.f32 %v942_v10  ;;  %v840_v17 = vsub.f32 0.0, %v1970_v44  ;;  %v848_v18 = vsub.f32 0.0, %v1973_v11 }
  0xeb   : > { %v1463_v19 = vpop.eup %1462  ;;  %v990_v20 = vmul.f32 %v1461_v15, %v1907_v47  ;;  %1474 = vrcp.f32 %v919_v13  ;;  %v825_v21 = vsub.f32 0.0, %v1977_v45  ;;  %v833_v22 = vsub.f32 0.0, %v1980_v14 }
  0xec   : > { %v1465_v23 = vpop.eup %1464  ;;  %1014 = vst [vmem:[%s1948_s8 + $0x8] sm:$0xff] %v982_v16  ;;  %v927_v26 = vadd.f32 1.0, %v1463_v19  ;;  %1476 = vpow2.f32 %v875_v56  ;;  %v891_v27 = vmul.f32 1.442695, %v840_v17  ;;  %v907_v46 = vmul.f32 1.442695, %v848_v18  ;;  %v620_v34 = vpop.f32.mrf.mxu2 }
  0xed   : > { %v1467_v28 = vpop.eup %1466  ;;  %1022 = vst [vmem:[%s1948_s8 + $0x48] sm:$0xff] %v990_v20  ;;  %v935_v29 = vadd.f32 1.0, %v1465_v23  ;;  %v861_v32 = vmul.f32 1.442695, %v825_v21  ;;  %v877_v33 = vmul.f32 1.442695, %v833_v22  ;;  %v640_v35 = vpop.f32.mrf.mxu3  ;;  %v773_v39 = vmul.f32 %v1876_v24, %v620_v34 }
  0xee   : > { %v1469_v47 = vpop.eup %1468  ;;  %v998_v36 = vmul.f32 %v1467_v28, %v1918_v4  ;;  %1478 = vrcp.f32 %v927_v26  ;;  %v781_v30 = vmul.f32 %v1876_v24, %v640_v35  ;;  %v582_v41 = vpop.f32.mrf.mxu0 }
  0xef   : > { %v602_v42 = vpop.f32.mrf.mxu1  ;;  %v1471_v43 = vpop.eup %1470  ;;  %1480 = vrcp.f32 %v935_v29  ;;  %v943_v48 = vadd.f32 1.0, %v1469_v47  ;;  %v758_v49 = vmul.f32 %v1876_v24, %v582_v41  ;;  %v1997_v4 = vadd.f32 %v1881_v25, %v773_v39 }
  0xf0   : > { %v766_v50 = vmul.f32 %v1876_v24, %v602_v42  ;;  %v1473_v51 = vpop.eup %1472  ;;  %1030 = vst [vmem:[%s1948_s8 + $0x88] sm:$0xff] %v998_v36  ;;  %v920_v52 = vadd.f32 1.0, %v1471_v43  ;;  %1482 = vpow2.f32 %v891_v27  ;;  %v2000_v53 = vadd.f32 %v1881_v25, %v781_v30 }
  0xf1   : > { %v1475_v54 = vpop.eup %1474  ;;  %v1006_v55 = vmul.f32 %v1473_v51, %v1921_v5  ;;  %1484 = vrcp.f32 %v943_v48  ;;  %v2004_v56 = vadd.f32 %v1881_v25, %v758_v49  ;;  %v841_v60 = vsub.f32 0.0, %v1997_v4 }
  0xf2   : > { %v2007_v57 = vadd.f32 %v1881_v25, %v766_v50  ;;  %v1477_v58 = vpop.eup %1476  ;;  %v983_v59 = vmul.f32 %v1475_v54, %v1924_v6  ;;  %1486 = vrcp.f32 %v920_v52  ;;  %v849_v61 = vsub.f32 0.0, %v2000_v53 }
  0xf3   : > { %1038 = vst [vmem:[%s1948_s8 + $0xc8] sm:$0xff] %v1006_v55  ;;  %v928_v62 = vadd.f32 1.0, %v1477_v58  ;;  %1488 = vpow2.f32 %v907_v46  ;;  %v826_v5 = vsub.f32 0.0, %v2004_v56  ;;  %v893_v1 = vmul.f32 1.442695, %v841_v60 }
  0xf4   : > { %v834_v63 = vsub.f32 0.0, %v2007_v57  ;;  %v1479_v0 = vpop.eup %1478  ;;  %1015 = vst [vmem:[%s1948_s8 + $0x10] sm:$0xff] %v983_v59  ;;  %1490 = vpow2.f32 %v861_v32  ;;  %v909_v2 = vmul.f32 1.442695, %v849_v61  ;;  %v622_v10 = vpop.f32.mrf.mxu2 }
  0xf5   : > { %v1481_v3 = vpop.eup %1480  ;;  %v991_v6 = vmul.f32 %v1479_v0, %v1927_v7  ;;  %1492 = vrcp.f32 %v928_v62  ;;  %v863_v8 = vmul.f32 1.442695, %v826_v5  ;;  %v642_v12 = vpop.f32.mrf.mxu3  ;;  %v774_v16 = vmul.f32 %v1876_v24, %v622_v10 }
  0xf6   : > { %v879_v9 = vmul.f32 1.442695, %v834_v63  ;;  %v1483_v13 = vpop.eup %1482  ;;  %v999_v15 = vmul.f32 %v1481_v3, %v1941_v37  ;;  %1494 = vpow2.f32 %v877_v33  ;;  %v782_v17 = vmul.f32 %v1876_v24, %v642_v12  ;;  %v585_v18 = vpop.f32.mrf.mxu0 }
  0xf7   : > { %v605_v19 = vpop.f32.mrf.mxu1  ;;  %v1485_v20 = vpop.eup %1484  ;;  %1023 = vst [vmem:[%s1948_s8 + $0x50] sm:$0xff] %v991_v6  ;;  %v936_v21 = vadd.f32 1.0, %v1483_v13  ;;  %1496 = vpow2.f32 %v893_v1  ;;  %v759_v7 = vmul.f32 %v1876_v24, %v585_v18  ;;  %v2026_v26 = vadd.f32 %v1881_v25, %v774_v16 }
  0xf8   : > { %v767_v22 = vmul.f32 %v1876_v24, %v605_v19  ;;  %v1487_v23 = vpop.eup %1486  ;;  %1031 = vst [vmem:[%s1948_s8 + $0x90] sm:$0xff] %v999_v15  ;;  %v1007_v37 = vmul.f32 %v1485_v20, %v1944_v38  ;;  %1498 = vpow2.f32 %v909_v2  ;;  %v2029_v27 = vadd.f32 %v1881_v25, %v782_v17 }
  0xf9   : > { %v1489_v46 = vpop.eup %1488  ;;  %v984_v28 = vmul.f32 %v1487_v23, %v1952_v40  ;;  %1500 = vrcp.f32 %v936_v21  ;;  %v2033_v29 = vadd.f32 %v1881_v25, %v759_v7  ;;  %v842_v34 = vsub.f32 0.0, %v2026_v26 }
  0xfa   : > { %v2036_v32 = vadd.f32 %v1881_v25, %v767_v22  ;;  %v1491_v33 = vpop.eup %1490  ;;  %1039 = vst [vmem:[%s1948_s8 + $0xd0] sm:$0xff] %v1007_v37  ;;  %v944_v38 = vadd.f32 1.0, %v1489_v46  ;;  %1502 = vpow2.f32 %v863_v8  ;;  %v850_v35 = vsub.f32 0.0, %v2029_v27 }
  0xfb   : > { %v1493_v47 = vpop.eup %1492  ;;  %1016 = vst [vmem:[%s1948_s8 + $0x18] sm:$0xff] %v984_v28  ;;  %v921_v36 = vadd.f32 1.0, %v1491_v33  ;;  %1504 = vpow2.f32 %v879_v9  ;;  %v827_v40 = vsub.f32 0.0, %v2033_v29  ;;  %v895_v42 = vmul.f32 1.442695, %v842_v34 }
  0xfc   : > { %v835_v39 = vsub.f32 0.0, %v2036_v32  ;;  %v1495_v30 = vpop.eup %1494  ;;  %v992_v41 = vmul.f32 %v1493_v47, %v1955_v31  ;;  %1506 = vrcp.f32 %v944_v38  ;;  %v911_v43 = vmul.f32 1.442695, %v850_v35  ;;  %v625_v52 = vpop.f32.mrf.mxu2 }
  0xfd   : > { %v1497_v48 = vpop.eup %1496  ;;  %1508 = vrcp.f32 %v921_v36  ;;  %v929_v49 = vadd.f32 1.0, %v1495_v30  ;;  %v865_v50 = vmul.f32 1.442695, %v827_v40  ;;  %v645_v54 = vpop.f32.mrf.mxu3  ;;  %v775_v59 = vmul.f32 %v1876_v24, %v625_v52 }
  0xfe   : > { %v881_v51 = vmul.f32 1.442695, %v835_v39  ;;  %v1499_v55 = vpop.eup %1498  ;;  %1024 = vst [vmem:[%s1948_s8 + $0x58] sm:$0xff] %v992_v41  ;;  %v937_v58 = vadd.f32 1.0, %v1497_v48  ;;  %1510 = vpow2.f32 %v895_v42  ;;  %v783_v60 = vmul.f32 %v1876_v24, %v645_v54  ;;  %v587_v61 = vpop.f32.mrf.mxu0 }
  0xff   : > { %v607_v31 = vpop.f32.mrf.mxu1  ;;  %v1501_v62 = vpop.eup %1500  ;;  %1512 = vrcp.f32 %v929_v49  ;;  %v945_v5 = vadd.f32 1.0, %v1499_v55  ;;  %v760_v63 = vmul.f32 %v1876_v24, %v587_v61  ;;  %v2052_v3 = vadd.f32 %v1881_v25, %v775_v59 }
 0x100   : > { %v768_v0 = vmul.f32 %v1876_v24, %v607_v31  ;;  %v1503_v1 = vpop.eup %1502  ;;  %v1000_v2 = vmul.f32 %v1501_v62, %v1970_v44  ;;  %1514 = vrcp.f32 %v937_v58  ;;  %v2055_v6 = vadd.f32 %v1881_v25, %v783_v60 }
 0x101   : > { %v1505_v8 = vpop.eup %1504  ;;  %1516 = vrcp.f32 %v945_v5  ;;  %v922_v9 = vadd.f32 1.0, %v1503_v1  ;;  %v2058_v10 = vadd.f32 %v1881_v25, %v760_v63  ;;  %v843_v15 = vsub.f32 0.0, %v2052_v3 }
 0x102   : > { %v2061_v12 = vadd.f32 %v1881_v25, %v768_v0  ;;  %v1507_v13 = vpop.eup %1506  ;;  %1032 = vst [vmem:[%s1948_s8 + $0x98] sm:$0xff] %v1000_v2  ;;  %v930_v44 = vadd.f32 1.0, %v1505_v8  ;;  %1518 = vpow2.f32 %v911_v43  ;;  %v851_v16 = vsub.f32 0.0, %v2055_v6 }
 0x103   : > { %v1509_v17 = vpop.eup %1508  ;;  %v1008_v18 = vmul.f32 %v1507_v13, %v1973_v11  ;;  %1520 = vrcp.f32 %v922_v9  ;;  %v828_v19 = vsub.f32 0.0, %v2058_v10  ;;  %v897_v22 = vmul.f32 1.442695, %v843_v15 }
 0x104   : > { %v836_v20 = vsub.f32 0.0, %v2061_v12  ;;  %v1511_v21 = vpop.eup %1510  ;;  %v985_v7 = vmul.f32 %v1509_v17, %v1977_v45  ;;  %1522 = vrcp.f32 %v930_v44  ;;  %v913_v46 = vmul.f32 1.442695, %v851_v16  ;;  %v627_v33 = vpop.f32.mrf.mxu2 }
 0x105   : > { %v1513_v23 = vpop.eup %1512  ;;  %1040 = vst [vmem:[%s1948_s8 + $0xd8] sm:$0xff] %v1008_v18  ;;  %v938_v37 = vadd.f32 1.0, %v1511_v21  ;;  %1524 = vpow2.f32 %v865_v50  ;;  %v867_v28 = vmul.f32 1.442695, %v828_v19  ;;  %v647_v11 = vpop.f32.mrf.mxu3  ;;  %v776_v35 = vmul.f32 %v1876_v24, %v627_v33 }
 0x106   : > { %v1515_v38 = vpop.eup %1514  ;;  %1017 = vst [vmem:[%s1948_s8 + $0x20] sm:$0xff] %v985_v7  ;;  %v993_v34 = vmul.f32 %v1513_v23, %v1980_v14  ;;  %1526 = vpow2.f32 %v881_v51  ;;  %v784_v45 = vmul.f32 %v1876_v24, %v647_v11  ;;  %v883_v40 = vmul.f32 1.442695, %v836_v20 }
 0x107   : > { %v1517_v47 = vpop.eup %1516  ;;  %v1001_v36 = vmul.f32 %v1515_v38, %v1997_v4  ;;  %1528 = vrcp.f32 %v938_v37  ;;  %v2079_v41 = vadd.f32 %v1881_v25, %v776_v35 }
 0x108   : > { %v1519_v39 = vpop.eup %1518  ;;  %1025 = vst [vmem:[%s1948_s8 + $0x60] sm:$0xff] %v993_v34  ;;  %v1009_v30 = vmul.f32 %v1517_v47, %v2000_v53  ;;  %1530 = vpow2.f32 %v897_v22  ;;  %v2082_v14 = vadd.f32 %v1881_v25, %v784_v45 }
 0x109   : > { %v1521_v42 = vpop.eup %1520  ;;  %1033 = vst [vmem:[%s1948_s8 + $0xa0] sm:$0xff] %v1001_v36  ;;  %v946_v24 = vadd.f32 1.0, %v1519_v39  ;;  %1532 = vpow2.f32 %v913_v46  ;;  %v844_v53 = vsub.f32 0.0, %v2079_v41 }
 0x10a   : > { %v1523_v4 = vpop.eup %1522  ;;  %1041 = vst [vmem:[%s1948_s8 + $0xe0] sm:$0xff] %v1009_v30  ;;  %v986_v43 = vmul.f32 %v1521_v42, %v2004_v56  ;;  %1534 = vpow2.f32 %v867_v28  ;;  %v852_v52 = vsub.f32 0.0, %v2082_v14 }
 0x10b   : > { %v1525_v48 = vpop.eup %1524  ;;  %v994_v49 = vmul.f32 %v1523_v4, %v2007_v57  ;;  %1536 = vrcp.f32 %v946_v24  ;;  %v899_v51 = vmul.f32 1.442695, %v844_v53 }
 0x10c   : > { %v1527_v50 = vpop.eup %1526  ;;  %1018 = vst [vmem:[%s1948_s8 + $0x28] sm:$0xff] %v986_v43  ;;  %v923_v25 = vadd.f32 1.0, %v1525_v48  ;;  %1538 = vpow2.f32 %v883_v40  ;;  %v915_v31 = vmul.f32 1.442695, %v852_v52 }
 0x10d   : > { %v1529_v54 = vpop.eup %1528  ;;  %1026 = vst [vmem:[%s1948_s8 + $0x68] sm:$0xff] %v994_v49  ;;  %v931_v55 = vadd.f32 1.0, %v1527_v50 }
 0x10e   : > { %v1531_v58 = vpop.eup %1530  ;;  %v1002_v56 = vmul.f32 %v1529_v54, %v2026_v26  ;;  %1540 = vrcp.f32 %v923_v25 }
 0x10f   : > { %v1533_v59 = vpop.eup %1532  ;;  %1542 = vrcp.f32 %v931_v55  ;;  %v939_v57 = vadd.f32 1.0, %v1531_v58 }
 0x110   : > { %v1535_v60 = vpop.eup %1534  ;;  %1034 = vst [vmem:[%s1948_s8 + $0xa8] sm:$0xff] %v1002_v56  ;;  %v947_v61 = vadd.f32 1.0, %v1533_v59  ;;  %1544 = vpow2.f32 %v899_v51 }
 0x111   : > { %v1537_v62 = vpop.eup %1536  ;;  %1546 = vrcp.f32 %v939_v57  ;;  %v924_v5 = vadd.f32 1.0, %v1535_v60 }
 0x112   : > { %v1539_v63 = vpop.eup %1538  ;;  %v1010_v0 = vmul.f32 %v1537_v62, %v2029_v27  ;;  %1548 = vrcp.f32 %v947_v61 }
 0x113   : > { %1550 = vrcp.f32 %v924_v5  ;;  %v932_v26 = vadd.f32 1.0, %v1539_v63 }
 0x114   : > { %v1541_v1 = vpop.eup %1540  ;;  %1042 = vst [vmem:[%s1948_s8 + $0xe8] sm:$0xff] %v1010_v0  ;;  %1552 = vpow2.f32 %v915_v31 }
 0x115   : > { %v1543_v2 = vpop.eup %1542  ;;  %v987_v8 = vmul.f32 %v1541_v1, %v2033_v29  ;;  %1554 = vrcp.f32 %v932_v26 }
 0x116   : > { %v1545_v9 = vpop.eup %1544  ;;  %v995_v13 = vmul.f32 %v1543_v2, %v2036_v32 }
 0x117   : > { %v1547_v44 = vpop.eup %1546  ;;  %1019 = vst [vmem:[%s1948_s8 + $0x30] sm:$0xff] %v987_v8  ;;  %v940_v27 = vadd.f32 1.0, %v1545_v9 }
 0x118   : > { %v1549_v15 = vpop.eup %1548  ;;  %1027 = vst [vmem:[%s1948_s8 + $0x70] sm:$0xff] %v995_v13  ;;  %v1003_v16 = vmul.f32 %v1547_v44, %v2052_v3 }
 0x119   : > { %v1551_v17 = vpop.eup %1550  ;;  %v1011_v18 = vmul.f32 %v1549_v15, %v2055_v6  ;;  %1556 = vrcp.f32 %v940_v27 }
 0x11a   : > { %v1553_v29 = vpop.eup %1552  ;;  %1035 = vst [vmem:[%s1948_s8 + $0xb0] sm:$0xff] %v1003_v16  ;;  %v988_v19 = vmul.f32 %v1551_v17, %v2058_v10 }
 0x11b   : > { %v1555_v32 = vpop.eup %1554  ;;  %1043 = vst [vmem:[%s1948_s8 + $0xf0] sm:$0xff] %v1011_v18  ;;  %v948_v20 = vadd.f32 1.0, %v1553_v29 }
 0x11c   : > { %1020 = vst [vmem:[%s1948_s8 + $0x38] sm:$0xff] %v988_v19  ;;  %v996_v21 = vmul.f32 %v1555_v32, %v2061_v12 }
 0x11d   : > { %1558 = vrcp.f32 %v948_v20 }
 0x11e   : > { %1028 = vst [vmem:[%s1948_s8 + $0x78] sm:$0xff] %v996_v21 }
 0x11f   : > { %v1557_v3 = vpop.eup %1556 }
 0x120   : > { %v1004_v6 = vmul.f32 %v1557_v3, %v2079_v41 }
 0x122   : > { %1036 = vst [vmem:[%s1948_s8 + $0xb8] sm:$0xff] %v1004_v6 }
 0x123   : > { %v1559_v10 = vpop.eup %1558 }
 0x124   : > { %v1012_v7 = vmul.f32 %v1559_v10, %v2082_v14 }
 0x126   : > { %1044 = vst [vmem:[%s1948_s8 + $0xf8] sm:$0xff] %v1012_v7 }
 0x127   : > { %1647 = shalt.err (!%p1644_p0)
}
 0x128   : > { %s1711_s10 = smov 128   ;;  %s1712_s25 = smov 8  }
 0x129   : > { %1359 = dma.vmem_to_hbm [thread:$0]  (%p1820_p5), %s1060_s29, 4096, %s1062_s18, %s1046_s5, %s1711_s10, %s1711_s10, %s1712_s25  }
 0x12a PF: > { %s1076_s30 = sand.u32 1, %s1686_s15   ;;  %p1370_p3 = pnand %p1194_p11, %p1787_p6 }
 0x12b   : > { %s1077_s7 = scalar_lea.sflag [#allocation5], %s1076_s30 }
 0x12c   : > { %p1371_p7 = pneg %p1370_p3 }
 0x12e   : > { %1681 = dma.done.wait (%p1371_p7), %s1077_s7, 4096  }
 0x12f   : > { %1683 = vsyncadd (%p1371_p7), %s1077_s7, 4294963200  ;;  %s21_s20 = sadd.s32 1, %s1706_s20   ;;  %s2171_s12 = sld [smem:[#allocation12_spill]] }
 0x130   : > { %p18_p9 = scmp.ge.s32.totalorder %s21_s20, 4   ;;  %s2172_s15 = smov %s1690_s16 }
 0x131   : > { %s2173_s16 = smov %s1694_s17  ;;  %s2174_s17 = smov %s1829_s22 }
 0x132   : > { %s2175_s18 = smov %s1702_s19  ;;  %20 = sbr.rel (!%p18_p9) target bundleno = 9 (0x9), region = 100 }
 0x135   : > { %s2176_s19 = smov %s2171_s12 }
 0x137   :  { %1083 = vsyncpa [#allocation4], 1 }
 0x138   :  { %1085 = vsyncpa [#allocation4 + $0x1], 1 }
 0x139   :  { %1086 = vsyncpa [#allocation7], 1 }
 0x13a   :  { %1087 = vsyncpa [#allocation5], 1 }
 0x13b   :  { %1089 = vsyncpa [#allocation5 + $0x1], 1 }

</bundles_post_ra>
